<compile_context>
chip_gen: v7x
topology: tpu7x:2x2x1
jax: 0.10.0
libtpu: 0.0.40
codegen_flags: <defaults>
</compile_context>

<pallas_src>
import jax
import jax.numpy as jnp
from jax.experimental import pallas as pl
from jax.experimental.pallas import tpu as pltpu


def attn_kernel(hh_ref, enc_ref, we_t_ref, v_ref, out_ref):
    # hh_ref : (BB, H)    f32   -- precomputed W_h @ hidden + bias
    # enc_ref: (BB, T, H) bf16  -- encoder tile for this batch block
    # we_t_ref: (H, H)    bf16  -- W_e^T (grid-invariant)
    # v_ref  : (1, H)     f32   -- score vector (grid-invariant)
    # out_ref: (BB, T)    f32
    BB, T, H = enc_ref.shape

    # Main matmul on the MXU: flatten (BB, T) rows so the LHS has BB*T rows.
    enc2 = enc_ref[...].reshape(BB * T, H)
    ee = jnp.dot(enc2, we_t_ref[...], preferred_element_type=jnp.float32)  # (BB*T, H)
    ee = ee.reshape(BB, T, H)

    # energy[b,t,h] = tanh(ee[b,t,h] + hh[b,h])  (EUP tanh, f32)
    energy = jnp.tanh(ee + hh_ref[...][:, None, :])                        # (BB, T, H)

    # scores[b,t] = energy[b,t,:] . v  -- VPU multiply + lane reduce (no N=1 matmul).
    scores = jnp.sum(energy * v_ref[...], axis=-1)                         # (BB, T)

    # Numerically stable softmax over T (last axis). Exact division so each
    # row sums to 1 (previous approx reciprocal violated this).
    m = jnp.max(scores, axis=-1, keepdims=True)
    e = jnp.exp(scores - m)
    denom = jnp.sum(e, axis=-1, keepdims=True)
    out_ref[...] = (e / denom).astype(out_ref.dtype)


def _pick_batch_block(B, T):
    """Batch rows per grid step: target >= 256 MXU LHS rows (v6e/v7x), capped by B.
    Block's second-to-last dim must be a multiple of 8 or equal the full dim."""
    target = max(1, -(-256 // T))          # cdiv(256, T)
    if B <= target:
        return B
    for bb in range(target - (target % 8), 0, -8):
        if B % bb == 0:
            return bb
    return B


def attn_forward(hidden, encoder_outputs, W, b, v):
    """hidden: (1, B, H); encoder_outputs: (T, B, H); W: (H, 2H); b: (H,); v: (H,).
    Returns attention weights of shape (B, 1, T), matching the PyTorch module."""
    _, B, H = hidden.shape
    T = encoder_outputs.shape[0]

    # One-time XLA work (cheap relative to the kernel's (T,H)x(H,H) stream):
    #   hidden projection + bias hoisted; encoder transposed batch-major and cast
    #   to bf16 (halves the dominant HBM stream, feeds bf16-native MXU); W_e
    #   pre-transposed + bf16.
    hh = (hidden[0] @ W[:, :H].T + b).astype(jnp.float32)                       # (B, H)
    enc_bth = jnp.transpose(encoder_outputs, (1, 0, 2)).astype(jnp.bfloat16)    # (B, T, H)
    we_t = W[:, H:].T.astype(jnp.bfloat16)                                      # (H, H)
    v2 = v.reshape(1, H).astype(jnp.float32)

    BB = _pick_batch_block(B, T)
    grid = (B // BB,)

    cost = pl.CostEstimate(
        flops=2 * B * T * H * H,
        transcendentals=B * T * H + B * T,
        bytes_accessed=2 * B * T * H + 2 * H * H + 4 * B * H + 4 * H + 4 * B * T,
    )

    out_bt = pl.pallas_call(
        attn_kernel,
        grid=grid,
        out_shape=jax.ShapeDtypeStruct((B, T), jnp.float32),
        in_specs=[
            pl.BlockSpec((BB, H), lambda i: (i, 0)),        # hh   (per batch block)
            pl.BlockSpec((BB, T, H), lambda i: (i, 0, 0)),  # encoder tile
            pl.BlockSpec((H, H), lambda i: (0, 0)),         # W_e^T (pinned)
            pl.BlockSpec((1, H), lambda i: (0, 0)),         # v     (pinned)
        ],
        out_specs=pl.BlockSpec((BB, T), lambda i: (i, 0)),
        compiler_params=pltpu.CompilerParams(
            dimension_semantics=("parallel",),
        ),
        cost_estimate=cost,
    )(hh, enc_bth, we_t, v2)

    return out_bt.reshape(B, 1, T)


def attn_reference(hidden, encoder_outputs, W, b, v):
    """Pure-JAX f32 reference mirroring the PyTorch forward."""
    _, B, H = hidden.shape
    T = encoder_outputs.shape[0]
    Hh = jnp.broadcast_to(hidden[0][:, None, :], (B, T, H))        # (B, T, H)
    enc = jnp.transpose(encoder_outputs, (1, 0, 2))                # (B, T, H)
    cat = jnp.concatenate([Hh, enc], axis=2)                       # (B, T, 2H)
    energy = jnp.tanh(cat @ W.T + b)                               # (B, T, H)
    scores = jnp.einsum('bth,h->bt', energy, v)                    # (B, T)
    return jax.nn.softmax(scores, axis=1)[:, None, :]              # (B, 1, T)


if __name__ == "__main__":
    B, T, H = 2, 8, 32

    key = jax.random.PRNGKey(0)
    k_hid, k_enc, k_w, k_b, k_v = jax.random.split(key, 5)

    # Deterministic parameter init (shapes from the module's __init__).
    stdv = 1.0 / (H ** 0.5)
    W = jax.random.uniform(k_w, (H, 2 * H), jnp.float32, -stdv, stdv)   # nn.Linear(2H, H).weight
    b = jax.random.uniform(k_b, (H,), jnp.float32, -stdv, stdv)         # nn.Linear(2H, H).bias
    v = stdv * jax.random.normal(k_v, (H,), jnp.float32)                # self.v ~ N(0, 1/sqrt(H))

    hidden = jax.random.normal(k_hid, (1, B, H), jnp.float32)           # (layers*dirs, B, H)
    encoder_outputs = jax.random.normal(k_enc, (T, B, H), jnp.float32)  # (T, B, H)

    out = attn_forward(hidden, encoder_outputs, W, b, v)
    out = jax.block_until_ready(out)

    ref = attn_reference(hidden, encoder_outputs, W, b, v)
    assert out.shape == (B, 1, T)
    # bf16 MXU inputs -> compare against the f32 reference at bf16-level tolerance.
    assert jnp.allclose(out, ref, atol=1e-2, rtol=1e-2), float(jnp.max(jnp.abs(out - ref)))
    # Exact softmax normalization: rows must sum to 1.
    assert jnp.allclose(jnp.sum(out, axis=-1), 1.0, atol=1e-4)

    print("KERNEL_OK")
</pallas_src>

<mosaic_0001>
module attributes {stable_mosaic.version = 11 : i64} {
  func.func @attn_kernel(%arg0: i32, %arg1: memref<2x32xf32, #tpu.memory_space<vmem>>, %arg2: memref<2x8x32xbf16, #tpu.memory_space<vmem>>, %arg3: memref<32x32xbf16, #tpu.memory_space<vmem>>, %arg4: memref<1x32xf32, #tpu.memory_space<vmem>>, %arg5: memref<2x8xf32, #tpu.memory_space<vmem>>) attributes {dimension_semantics = [#tpu.dimension_semantics<parallel>], iteration_bounds = array<i64: 1>, scalar_prefetch = 0 : i64, scratch_operands = 0 : i64, tpu.core_type = #tpu.core_type<tc>, window_params = [{transform_indices = @transform_0, window_bounds = array<i64: 2, 32>}, {transform_indices = @transform_1, window_bounds = array<i64: 2, 8, 32>}, {pipeline_mode = #tpu.pipeline_mode<synchronous>, transform_indices = @transform_2, window_bounds = array<i64: 32, 32>}, {pipeline_mode = #tpu.pipeline_mode<synchronous>, transform_indices = @transform_3, window_bounds = array<i64: 1, 32>}, {transform_indices = @transform_4, window_bounds = array<i64: 2, 8>}]} {
    %c0 = arith.constant 0 : index
    %c0_0 = arith.constant 0 : index
    %c0_1 = arith.constant 0 : index
    %0 = vector.load %arg2[%c0, %c0_0, %c0_1] : memref<2x8x32xbf16, #tpu.memory_space<vmem>>, vector<2x8x32xbf16>
    %1 = vector.shape_cast %0 : vector<2x8x32xbf16> to vector<16x32xbf16>
    %c0_2 = arith.constant 0 : index
    %c0_3 = arith.constant 0 : index
    %2 = vector.load %arg3[%c0_2, %c0_3] : memref<32x32xbf16, #tpu.memory_space<vmem>>, vector<32x32xbf16>
    %cst = arith.constant dense<0.000000e+00> : vector<16x32xf32>
    %3 = tpu.matmul %1, %2, %cst {dimension_numbers = #tpu.dot_dimension_numbers<[1], [0], [0], [1], [0, 0, 1, 1], [], []>} : vector<16x32xbf16>, vector<32x32xbf16>, vector<16x32xf32> -> vector<16x32xf32>
    %4 = vector.shape_cast %3 : vector<16x32xf32> to vector<2x8x32xf32>
    %c0_4 = arith.constant 0 : index
    %c0_5 = arith.constant 0 : index
    %5 = vector.load %arg1[%c0_4, %c0_5] : memref<2x32xf32, #tpu.memory_space<vmem>>, vector<2x32xf32>
    %6 = vector.shape_cast %5 : vector<2x32xf32> to vector<2x1x32xf32>
    %7 = vector.broadcast %6 : vector<2x1x32xf32> to vector<2x8x32xf32>
    %8 = arith.addf %4, %7 : vector<2x8x32xf32>
    %9 = math.tanh %8 : vector<2x8x32xf32>
    %c0_6 = arith.constant 0 : index
    %c0_7 = arith.constant 0 : index
    %10 = vector.load %arg4[%c0_6, %c0_7] : memref<1x32xf32, #tpu.memory_space<vmem>>, vector<1x32xf32>
    %11 = vector.shape_cast %10 : vector<1x32xf32> to vector<1x1x32xf32>
    %12 = vector.broadcast %11 : vector<1x1x32xf32> to vector<2x8x32xf32>
    %13 = arith.mulf %9, %12 : vector<2x8x32xf32>
    %cst_8 = arith.constant dense<0.000000e+00> : vector<2x8xf32>
    %14 = vector.multi_reduction <add>, %13, %cst_8 [2] : vector<2x8x32xf32> to vector<2x8xf32>
    %cst_9 = arith.constant dense<0xFF800000> : vector<2xf32>
    %15 = vector.multi_reduction <maximumf>, %14, %cst_9 [1] : vector<2x8xf32> to vector<2xf32>
    %16 = vector.shape_cast %15 : vector<2xf32> to vector<2x1xf32>
    %17 = vector.broadcast %16 : vector<2x1xf32> to vector<2x8xf32>
    %18 = arith.subf %14, %17 : vector<2x8xf32>
    %19 = math.exp %18 : vector<2x8xf32>
    %cst_10 = arith.constant dense<0.000000e+00> : vector<2xf32>
    %20 = vector.multi_reduction <add>, %19, %cst_10 [1] : vector<2x8xf32> to vector<2xf32>
    %21 = vector.shape_cast %20 : vector<2xf32> to vector<2x1xf32>
    %22 = vector.broadcast %21 : vector<2x1xf32> to vector<2x8xf32>
    %23 = arith.divf %19, %22 : vector<2x8xf32>
    %c0_11 = arith.constant 0 : index
    %c0_12 = arith.constant 0 : index
    %24 = vector.load %arg5[%c0_11, %c0_12] : memref<2x8xf32, #tpu.memory_space<vmem>>, vector<2x8xf32>
    tpu.vector_store %arg5[%c0_11, %c0_12], %23 {strides = array<i32>} : memref<2x8xf32, #tpu.memory_space<vmem>>, vector<2x8xf32>,
    return
  }
  func.func @transform_0(%arg0: i32) -> (i32, i32) {
    %c0_i32 = arith.constant 0 : i32
    %c0_i32_0 = arith.constant 0 : i32
    return %arg0, %c0_i32 : i32, i32
  }
  func.func @transform_1(%arg0: i32) -> (i32, i32, i32) {
    %c0_i32 = arith.constant 0 : i32
    %c0_i32_0 = arith.constant 0 : i32
    %c0_i32_1 = arith.constant 0 : i32
    return %arg0, %c0_i32, %c0_i32_0 : i32, i32, i32
  }
  func.func @transform_2(%arg0: i32) -> (i32, i32) {
    %c0_i32 = arith.constant 0 : i32
    %c0_i32_0 = arith.constant 0 : i32
    %c0_i32_1 = arith.constant 0 : i32
    return %c0_i32, %c0_i32_0 : i32, i32
  }
  func.func @transform_3(%arg0: i32) -> (i32, i32) {
    %c0_i32 = arith.constant 0 : i32
    %c0_i32_0 = arith.constant 0 : i32
    %c0_i32_1 = arith.constant 0 : i32
    return %c0_i32, %c0_i32_0 : i32, i32
  }
  func.func @transform_4(%arg0: i32) -> (i32, i32) {
    %c0_i32 = arith.constant 0 : i32
    %c0_i32_0 = arith.constant 0 : i32
    return %arg0, %c0_i32 : i32, i32
  }
}

</mosaic_0001>

<bundles_post_ra>
// kernel: tpu_custom_call.1
= control target key start
LH: loop header
LB: loop body
LE: loop exit
PB: predicated region body
PF: predicated region fallthrough
CT: control target
= control target key end

     0   :  { %9 = vsyncpa [#allocation3], 0  ;;  %s531_s0 = inlined_call_operand.hbm [shape: f32[2,32], index: 0, kind: input, shape index: {}]   ;;  %s532_s1 = inlined_call_operand.hbm [shape: bf16[2,8,32], index: 1, kind: input, shape index: {}]   ;;  %s533_s2 = inlined_call_operand.hbm [shape: bf16[32,32], index: 2, kind: input, shape index: {}]   ;;  %s534_s3 = inlined_call_operand.vmem [shape: f32[1,32], index: 3, kind: input, shape index: {}]   ;;  %s535_s4 = inlined_call_operand.hbm [shape: f32[2,8], index: 4, kind: output, shape index: {}]  }
   0x1   :  { %10 = vsyncpa [#allocation6], 0 }
   0x2   :  { %11 = vsyncpa [#allocation4], 0  ;;  %s424_s15 = smov [#allocation5]   ;;  %s330_s19 = scalar_lea.hbm %s532_s1, 128 }
   0x3   :  { %s27_s16 = sshll.u32 %s424_s15, 4  ;;  %p331_p0 = scmp.ne.s32.totalorder %s532_s1, %s330_s19  ;;  %s28_s16 = int_to_ptr.vmem [resolvable:$true] %s27_s16 }
   0x4   :  { %p334_p1 = scmp.lt.u32.totalorder %s330_s19, %s532_s1 }
   0x6   :  { %p336_p2 = pnand %p334_p1, %p331_p0 }
   0x8   :  { %339 = shalt.err (!%p336_p2)
}
   0x9   :  { %s340_s24 = scalar_lea.vmem %s28_s16, 128  ;;  %p345_p4 = scmp.lt.s32.totalorder %s28_s16, %s28_s16 }
   0xa   :  { %p341_p3 = scmp.ne.s32.totalorder %s28_s16, %s340_s24  ;;  %p346_p5 = scmp.lt.s32.totalorder %s340_s24, %s340_s24 }
   0xc   :  { %p347_p6 = por %p346_p5, %p345_p4 }
   0xe   :  { %p348_p7 = pnand %p347_p6, %p341_p3 }
  0x10   :  { %351 = shalt.err (!%p348_p7)
}
  0x11   :  { %s425_s25 = smov 64   ;;  %s426_s26 = smov 4  }
  0x12   :  { %33 = dma.hbm_to_vmem [thread:$0]  %s532_s1, 128, %s28_s16, [#allocation6], %s425_s25, %s425_s25, %s426_s26  }
  0x13   :  { %s427_s29 = smov [#allocation2]   ;;  %s428_s5 = smov [#allocation7]  }
  0x14   :  { %s18_s30 = sshll.u32 %s427_s29, 4  ;;  %s39_s6 = sshll.u32 %s428_s5, 4  ;;  %s19_s30 = int_to_ptr.vmem [resolvable:$true] %s18_s30  ;;  %s40_s6 = int_to_ptr.vmem [resolvable:$true] %s39_s6 }
  0x15   :  { %s352_s9 = scalar_lea.hbm %s531_s0, 32 }
  0x16   :  { %p353_p8 = scmp.ne.s32.totalorder %s531_s0, %s352_s9  ;;  %p356_p9 = scmp.lt.u32.totalorder %s352_s9, %s531_s0 }
  0x18   :  { %p358_p10 = pnand %p356_p9, %p353_p8 }
  0x1a   :  { %361 = shalt.err (!%p358_p10)
}
  0x1b   :  { %s362_s1 = scalar_lea.vmem %s19_s30, 32  ;;  %p367_p12 = scmp.lt.s32.totalorder %s19_s30, %s19_s30 }
  0x1c   :  { %p363_p11 = scmp.ne.s32.totalorder %s19_s30, %s362_s1  ;;  %p368_p13 = scmp.lt.s32.totalorder %s362_s1, %s362_s1 }
  0x1e   :  { %p369_p0 = por %p368_p13, %p367_p12 }
  0x20   :  { %p370_p1 = pnand %p369_p0, %p363_p11 }
  0x22   :  { %373 = shalt.err (!%p370_p1)
}
  0x23   :  { %21 = dma.hbm_to_vmem [thread:$0]  %s531_s0, 32, %s19_s30, [#allocation3]  }
  0x24   :  { %s374_s18 = scalar_lea.hbm %s533_s2, 256 }
  0x25   :  { %p375_p2 = scmp.ne.s32.totalorder %s533_s2, %s374_s18  ;;  %p378_p3 = scmp.lt.u32.totalorder %s374_s18, %s533_s2 }
  0x27   :  { %p380_p4 = pnand %p378_p3, %p375_p2 }
  0x29   :  { %383 = shalt.err (!%p380_p4)
}
  0x2a   :  { %s384_s23 = scalar_lea.vmem %s40_s6, 256  ;;  %p389_p6 = scmp.lt.s32.totalorder %s40_s6, %s40_s6 }
  0x2b   :  { %p385_p5 = scmp.ne.s32.totalorder %s40_s6, %s384_s23  ;;  %p390_p7 = scmp.lt.s32.totalorder %s384_s23, %s384_s23 }
  0x2d   :  { %p391_p8 = por %p390_p7, %p389_p6 }
  0x2f   :  { %p392_p9 = pnand %p391_p8, %p385_p5 }
  0x31   :  { %395 = shalt.err (!%p392_p9)
}
  0x32   :  { %45 = dma.hbm_to_vmem [thread:$0]  %s533_s2, 256, %s40_s6, [#allocation6], %s425_s25, %s425_s25, %s426_s26  }
  0x33   :  { %418 = dma.done.wait [#allocation3], 32  }
  0x34   :  { %419 = vsyncadd [#allocation3], 4294967264 }
  0x35   :  { %420 = dma.done.wait [#allocation6], 384  }
  0x36   :  { %421 = vsyncadd [#allocation6], 4294966912  ;;  %v429_v0 = vmov 0.0   ;;  %vm430_vm0 = vmmov 0   ;;  %v315_v1 = vld [vmem:[#allocation7] sm:$0xff]   ;;  %v316_v2 = vld [vmem:[#allocation7 + $0x8] sm:$0xff]   ;;  %v139_v6 = vlaneseq }
  0x37   :  { %295 = vmatprep.subr.bf16.mxu0 %v429_v0  ;;  %299 = vmatprep.mubr.msk.bf16.mxu0 %vm430_vm0, %v429_v0  ;;  %v317_v3 = vld [vmem:[#allocation5] sm:$0xff]   ;;  %vm81_vm1 = vcmask 261120   ;;  %v431_v4 = vmov 1966171168   ;;  %v291_v23 = vld [vmem:[%s534_s3] ss:$0 sm:$0xff] }
  0x38   :  { %296 = vmatpush3.bf16.msra.mxu0 %v315_v1  ;;  %v137_v5 = vunpack.c.l.s4 %v431_v4  ;;  %v502_v8 = vshrl.u32 %v139_v6, 7  ;;  %v290_v9 = vld.sshfl [vmem:[#allocation2] sm:$0x11 pattern:$0x75316420]  ;;  %v182_v30 = vand.u32 127, %v139_v6 }
  0x39   :  { %297 = vmatprep.subr.bf16.mxu0 %v429_v0  ;;  %v135_v11 = vcombine.high %v290_v9, %v290_v9  ;;  %vm191_vm2 = vcmask 1041409   ;;  %vm194_vm3 = vcmask 58368   ;;  %v432_v38 = vmov 0   ;;  %s433_s3 = smov [#allocation8]  }
  0x3a   :  { %v138_v7 = vunpack.c.0.s8 %v137_v5  ;;  %v152_v13 = vsub.s32 0, %v502_v8  ;;  %v185_v32 = vsub.s32 %v182_v30, %v502_v8  ;;  %314 = vset.pattern.permute.xlu0 %v432_v38  ;;  %313 = vset.pattern.permute.xlu1 %v432_v38  ;;  %v205_v39 = vsub.s32 1, %v502_v8  ;;  %s276_s26 = sshll.u32 %s433_s3, 4  ;;  %s277_s26 = int_to_ptr.vmem [resolvable:$true] %s276_s26 }
  0x3b   :  { %s396_s27 = scalar_lea.vmem %s277_s26, 32  ;;  %p401_p11 = scmp.lt.s32.totalorder %s277_s26, %s277_s26 }
  0x3c   :  { %298 = vmatpush3.bf16.msra.mxu0 %v316_v2  ;;  %v141_v10 = vsub.s32 %v138_v7, %v502_v8  ;;  %p397_p10 = scmp.ne.s32.totalorder %s277_s26, %s396_s27  ;;  %p402_p12 = scmp.lt.s32.totalorder %s396_s27, %s396_s27 }
  0x3e   :  { %v142_v12 = vrot.slane %v290_v9, %v141_v10  ;;  %v149_v14 = vrot.slane %v135_v11, %v141_v10  ;;  %p403_p13 = por %p402_p12, %p401_p11 }
  0x3f   :  { %300 = vmatmul.mubr.msk.bf16.vlgmr.msra.gmra.mrb[0].mxu0 %vm81_vm1, %v317_v3 }
  0x40   :  { %v153_v15 = vrot.slane %v142_v12, %v152_v13  ;;  %v157_v16 = vrot.slane %v149_v14, %v152_v13  ;;  %p404_p0 = pnand %p403_p13, %p397_p10 }
 0x112   :  { %v119_v17 = vpop.f32.mrb[0].mxu0 }
 0x113   :  { %v160_v18 = vadd.f32 %v153_v15, %v119_v17  ;;  %v301_v19 = vpop.f32.mrb[1].mxu0 }
 0x114   :  { %v122_v20 = vpop.f32.mrb[2].mxu0 }
 0x115   :  { %318 = vtanh.f32 %v160_v18  ;;  %v161_v21 = vadd.f32 %v157_v16, %v122_v20  ;;  %v302_v22 = vpop.f32.mrb[3].mxu0 }
 0x117   :  { %320 = vtanh.f32 %v161_v21 }
 0x11f   :  { %v319_v24 = vpop.eup %318 }
 0x120   :  { %v171_v25 = vmul.f32 %v319_v24, %v291_v23 }
 0x121   :  { %v321_v26 = vpop.eup %320 }
 0x122   :  { %v173_v27 = vsel %vm81_vm1, %v171_v25, 0.0  ;;  %v172_v28 = vmul.f32 %v321_v26, %v291_v23 }
 0x123   :  { %174 = vadd.xlane.f32.xlu0 %v173_v27 }
 0x124   :  { %v176_v29 = vsel %vm81_vm1, %v172_v28, 0.0 }
 0x127   :  { %177 = vadd.xlane.f32.xlu0 %v176_v29 }
 0x1b0   :  { %v175_v31 = vpop.xlane.xlu0 %174 }
 0x1b1   :  { %v186_v34 = vrot.slane %v175_v31, %v185_v32 }
 0x1b4   :  { %v178_v33 = vpop.xlane.xlu0 %177 }
 0x1b5   :  { %v190_v35 = vrot.slane %v178_v33, %v185_v32 }
 0x1b7   :  { %v192_v36 = vsel %vm191_vm2, %v190_v35, %v186_v34 }
 0x1b8   :  { %v195_v37 = vsel %vm194_vm3, %v192_v36, -inf }
 0x1b9   :  { %196 = vmax.xlane.f32.xlu1 %v195_v37 }
 0x246   :  { %v197_v40 = vpop.xlane.xlu1 %196 }
 0x247   :  { %v202_v41 = vrot.slane %v197_v40, %v152_v13  ;;  %v206_v42 = vrot.slane %v197_v40, %v205_v39 }
 0x249   :  { %v209_v43 = vsub.f32 %v175_v31, %v202_v41  ;;  %v210_v44 = vsub.f32 %v178_v33, %v206_v42 }
 0x24b   :  { %v211_v45 = vmul.f32 1.442695, %v209_v43  ;;  %v213_v46 = vmul.f32 1.442695, %v210_v44 }
 0x24d   :  { %322 = vpow2.f32 %v211_v45 }
 0x24e   :  { %324 = vpow2.f32 %v213_v46 }
 0x257   :  { %v323_v47 = vpop.eup %322 }
 0x258   :  { %v325_v48 = vpop.eup %324  ;;  %218 = vperm.xlu1 %313, %v323_v47  }
 0x259   :  { %221 = vperm.xlu0 %314, %v325_v48  }
 0x2d7   :  { %v219_v49 = vpop.permute.xlu1 %218 }
 0x2d8   :  { %v222_v50 = vpop.permute.xlu0 %221  ;;  %v226_v51 = vrot.slane %v219_v49, %v185_v32 }
 0x2d9   :  { %v230_v52 = vrot.slane %v222_v50, %v185_v32 }
 0x2db   :  { %v231_v53 = vsel %vm191_vm2, %v230_v52, %v226_v51 }
 0x2dc   :  { %v233_v54 = vsel %vm194_vm3, %v231_v53, 0.0 }
 0x2dd   :  { %234 = vadd.xlane.f32.xlu1 %v233_v54 }
 0x36a   :  { %v235_v55 = vpop.xlane.xlu1 %234 }
 0x36b   :  { %v240_v56 = vrot.slane %v235_v55, %v152_v13  ;;  %v244_v57 = vrot.slane %v235_v55, %v205_v39 }
 0x36d   :  { %326 = vrcp.f32 %v240_v56 }
 0x36e   :  { %328 = vrcp.f32 %v244_v57 }
 0x377   :  { %v327_v58 = vpop.eup %326 }
 0x378   :  { %v248_v59 = vmul.f32 %v327_v58, %v323_v47  ;;  %v329_v60 = vpop.eup %328 }
 0x379   :  { %v250_v61 = vmul.f32 %v329_v60, %v325_v48 }
 0x37a   :  { %254 = vperm.xlu0 %314, %v248_v59  }
 0x37e   :  { %257 = vperm.xlu0 %314, %v250_v61  }
 0x3f9   :  { %v255_v62 = vpop.permute.xlu0 %254 }
 0x3fa   :  { %v262_v0 = vrot.slane %v255_v62, %v185_v32 }
 0x3fd   :  { %v258_v63 = vpop.permute.xlu0 %257 }
 0x3fe   :  { %v266_v1 = vrot.slane %v258_v63, %v185_v32 }
 0x400   :  { %v267_v2 = vsel %vm191_vm2, %v266_v1, %v262_v0 }
 0x401   :  { %269 = vst.msk [vmem:[#allocation8] sm:$0x3] %vm194_vm3, %v267_v2 }
 0x402   :  { %407 = shalt.err (!%p404_p0)
}
 0x403   :  { %s408_s30 = scalar_lea.hbm %s535_s4, 32 }
 0x404   :  { %p409_p1 = scmp.ne.s32.totalorder %s535_s4, %s408_s30  ;;  %p412_p2 = scmp.lt.u32.totalorder %s408_s30, %s535_s4 }
 0x406   :  { %p414_p3 = pnand %p412_p2, %p409_p1 }
 0x408   :  { %417 = shalt.err (!%p414_p3)
}
 0x409   :  { %279 = dma.vmem_to_hbm [thread:$0]  %s277_s26, 32, %s535_s4, [#allocation4]  }
 0x40a   :  { %422 = dma.done.wait [#allocation4], 32  }
 0x40b   :  { %423 = vsyncadd [#allocation4], 4294967264 }
 0x40c   :  { %283 = vsyncpa [#allocation3], 1 }
 0x40d   :  { %284 = vsyncpa [#allocation6], 1 }
 0x40e   :  { %285 = vsyncpa [#allocation4], 1 }

</bundles_post_ra>
